<compile_context>
chip_gen: v7x
topology: tpu7x:2x2x1
jax: 0.10.0
libtpu: 0.0.40
codegen_flags: <defaults>
</compile_context>

<pallas_src>
import functools

import jax
import jax.numpy as jnp
from jax import lax
from jax.experimental import pallas as pl
from jax.experimental.pallas import tpu as pltpu


def _round_up(x, m):
    return (x + m - 1) // m * m


def _tpu_vmem_capacity():
    """Best-effort per-core VMEM capacity; conservative (v7x-sized) fallback."""
    try:
        info = pltpu.get_tpu_info()
        cap = getattr(info, "vmem_capacity_bytes", None)
        if cap:
            return int(cap)
    except Exception:
        pass
    return 64 * 1024 * 1024


def _pick_tc(c_out_pad, lp, batch, max_tc, f32_budget):
    """Output-channel tile: largest multiple-of-8 divisor of c_out_pad that
    (a) fits the MXU-friendly cap and (b) keeps the (TC, Lp) f32 intermediate within budget,
    while (c) leaving >= 2 parallel grid steps when possible (v7x has 2 TensorCores)."""
    divisors = [d for d in range(8, c_out_pad + 1, 8) if c_out_pad % d == 0]
    ok = [d for d in divisors if d <= max_tc and d * lp * 4 <= f32_budget]
    if not ok:
        ok = [min(divisors)]
    tc = max(ok)
    if batch * (c_out_pad // tc) < 2:
        smaller = [d for d in ok if d < tc]
        if smaller:
            tc = max(smaller)
    return tc


# ---------------------------------------------------------------------------
# Kernel: single fused conv-as-matmul + one-pass InstanceNorm + LeakyReLU
# ---------------------------------------------------------------------------
def _unet_down_kernel(x_ref, w_ref, o_ref, *, inv_cnt, eps, neg_slope, normalize):
    # x_ref: (1, K, Lp)  bf16  -- stacked 4x4-tap contraction, spatial (row-major) on lanes,
    #                             zero-padded past the true L -> padded lanes give exact 0 below.
    # w_ref: (TC, K)     bf16  -- conv weight, flattened (c, kh, kw) contraction.
    # o_ref: (1, TC, Lp) bf16  -- channels on sublanes, lane-dense spatial store.
    y = jnp.dot(w_ref[...], x_ref[0], preferred_element_type=jnp.float32)   # (TC, Lp) f32

    if normalize:
        # InstanceNorm2d (affine=False, biased variance), one pass.  Padded lanes are exactly 0,
        # so full-width sums equal the valid-only sums; divide by the true count (inv_cnt = 1/L).
        mean = jnp.sum(y, axis=1, keepdims=True) * inv_cnt                  # (TC, 1)
        ex2 = jnp.sum(y * y, axis=1, keepdims=True) * inv_cnt
        var = jnp.maximum(ex2 - mean * mean, 0.0)
        y = (y - mean) * lax.rsqrt(var + eps)

    # LeakyReLU(0.2)
    y = jnp.where(y >= 0, y, neg_slope * y)
    o_ref[0] = y.astype(o_ref.dtype)


# ---------------------------------------------------------------------------
# Wrapper: bf16 tap-stack relayout, pallas_call, strip pad + free reshape back to NCHW
# ---------------------------------------------------------------------------
def unet_down(x, weight, *, normalize=True, dropout=0.0, eps=1e-5, neg_slope=0.2,
              out_dtype=jnp.bfloat16):
    """x: (N, C_in, H, W), weight: (C_out, C_in, 4, 4) -> (N, C_out, H//2, W//2)."""
    N, C_in, H, W = x.shape
    C_out = weight.shape[0]
    assert weight.shape == (C_out, C_in, 4, 4)
    assert H % 2 == 0 and W % 2 == 0, "UNetDown expects even spatial dims"

    OH, OW = H // 2, W // 2
    L = OH * OW
    Lp = _round_up(L, 128)            # lane-dense output stores / clean out DMA
    K = 16 * C_in                     # fused contraction (always a multiple of 16 -> bf16 tiles)
    C_out_pad = _round_up(C_out, 8)

    # --- input: cast bf16 FIRST, zero-pad by 1, stack the 16 (kh,kw) taps along K ---
    xp = jnp.pad(x.astype(jnp.bfloat16), ((0, 0), (0, 0), (1, 1), (1, 1)))   # (N, C, H+2, W+2)
    taps = [xp[:, :, kh:kh + 2 * OH:2, kw:kw + 2 * OW:2]                     # (N, C, OH, OW)
            for kh in range(4) for kw in range(4)]
    rhs = jnp.stack(taps, axis=2).reshape(N, K, L)       # K index = c*16 + kh*4 + kw
    rhs = jnp.pad(rhs, ((0, 0), (0, 0), (0, Lp - L)))    # zero-padded tail -> exact 0 after dot

    # --- weight: (C_out, C_in, 4, 4) -> (C_out_pad, K) bf16, same contraction ordering ---
    w = weight.reshape(C_out, K).astype(jnp.bfloat16)
    if C_out_pad != C_out:
        w = jnp.pad(w, ((0, C_out_pad - C_out), (0, 0)))  # zero rows -> zero output, stripped later

    # --- per-generation budgets and output-channel tiling ---
    vmem_cap = _tpu_vmem_capacity()
    vmem_limit = max(32 * 1024 * 1024, min(int(vmem_cap * 0.75), 100 * 1024 * 1024))
    max_tc = 256 if vmem_cap >= 100 * 1024 * 1024 else 128   # TC=256 only where VMEM allows (v6e)
    TC = _pick_tc(C_out_pad, Lp, N, max_tc, f32_budget=max(4 * 1024 * 1024, vmem_cap // 8))
    n_co = C_out_pad // TC

    kernel = functools.partial(_unet_down_kernel, inv_cnt=1.0 / float(L), eps=eps,
                               neg_slope=neg_slope, normalize=normalize)

    out3 = pl.pallas_call(
        kernel,
        out_shape=jax.ShapeDtypeStruct((N, C_out_pad, Lp), out_dtype),
        grid_spec=pltpu.PrefetchScalarGridSpec(
            num_scalar_prefetch=0,
            grid=(N, n_co),
            in_specs=[
                # stacked image block stays resident across the co axis (same block index)
                pl.BlockSpec((1, K, Lp), lambda n, co: (n, 0, 0)),
                pl.BlockSpec((TC, K), lambda n, co: (co, 0)),
            ],
            out_specs=pl.BlockSpec((1, TC, Lp), lambda n, co: (n, co, 0)),
        ),
        compiler_params=pltpu.CompilerParams(
            dimension_semantics=("parallel", "parallel"),
            vmem_limit_bytes=vmem_limit,
        ),
    )(rhs, w)

    # TODO(synk): dropout > 0.0 (training-mode random masking) not implemented; the module default
    # (dropout=0.0) and eval mode are identity, which is what we compute.
    del dropout

    # strip channel/lane padding (free slice) and reshape flattened spatial back to (OH, OW)
    return out3[:, :C_out, :L].reshape(N, C_out, OH, OW)


# ---------------------------------------------------------------------------
# Pure-JAX reference (f32) for correctness check
# ---------------------------------------------------------------------------
def unet_down_ref(x, weight, *, eps=1e-5, neg_slope=0.2):
    y = lax.conv_general_dilated(
        x, weight, window_strides=(2, 2), padding=((1, 1), (1, 1)),
        dimension_numbers=("NCHW", "OIHW", "NCHW"))
    mean = jnp.mean(y, axis=(2, 3), keepdims=True)
    var = jnp.mean((y - mean) ** 2, axis=(2, 3), keepdims=True)
    yn = (y - mean) * lax.rsqrt(var + eps)
    return jnp.where(yn >= 0, yn, neg_slope * yn)


if __name__ == "__main__":
    key = jax.random.PRNGKey(0)
    kx, kw = jax.random.split(key)

    N, C_in, H, W = 2, 4, 16, 16
    C_out = 8

    x = jax.random.normal(kx, (N, C_in, H, W), dtype=jnp.float32)
    fan_in = C_in * 4 * 4
    bound = (1.0 / fan_in) ** 0.5
    weight = jax.random.uniform(kw, (C_out, C_in, 4, 4), jnp.float32, -bound, bound)

    out = jax.block_until_ready(unet_down(x, weight, normalize=True, dropout=0.0))
    ref = jax.block_until_ready(unet_down_ref(x, weight))

    assert out.shape == (N, C_out, H // 2, W // 2), out.shape
    err = float(jnp.max(jnp.abs(out.astype(jnp.float32) - ref)))
    # bf16 MXU operands + bf16 output storage with f32 accumulation/normalization.
    assert err < 5e-2, err
    print("KERNEL_OK")
</pallas_src>

<mosaic_0001>
module attributes {stable_mosaic.version = 11 : i64} {
  func.func @_unet_down_kernel(%arg0: i32, %arg1: i32, %arg2: memref<1x64x128xbf16, #tpu.memory_space<vmem>>, %arg3: memref<8x64xbf16, #tpu.memory_space<vmem>>, %arg4: memref<1x8x128xbf16, #tpu.memory_space<vmem>>) attributes {dimension_semantics = [#tpu.dimension_semantics<parallel>, #tpu.dimension_semantics<parallel>], iteration_bounds = array<i64: 2, 1>, scalar_prefetch = 0 : i64, scratch_operands = 0 : i64, tpu.core_type = #tpu.core_type<tc>, window_params = [{transform_indices = @transform_0, window_bounds = array<i64: 1, 64, 128>}, {transform_indices = @transform_1, window_bounds = array<i64: 8, 64>}, {transform_indices = @transform_2, window_bounds = array<i64: 1, 8, 128>}]} {
    %c0 = arith.constant 0 : index
    %c0_0 = arith.constant 0 : index
    %0 = vector.load %arg3[%c0, %c0_0] : memref<8x64xbf16, #tpu.memory_space<vmem>>, vector<8x64xbf16>
    %c0_1 = arith.constant 0 : index
    %c0_2 = arith.constant 0 : index
    %c0_3 = arith.constant 0 : index
    %1 = vector.load %arg2[%c0_1, %c0_2, %c0_3] : memref<1x64x128xbf16, #tpu.memory_space<vmem>>, vector<1x64x128xbf16>
    %2 = vector.shape_cast %1 : vector<1x64x128xbf16> to vector<64x128xbf16>
    %cst = arith.constant dense<0.000000e+00> : vector<8x128xf32>
    %3 = tpu.matmul %0, %2, %cst {dimension_numbers = #tpu.dot_dimension_numbers<[1], [0], [0], [1], [0, 0, 1, 1], [], []>} : vector<8x64xbf16>, vector<64x128xbf16>, vector<8x128xf32> -> vector<8x128xf32>
    %cst_4 = arith.constant dense<0.000000e+00> : vector<8xf32>
    %4 = vector.multi_reduction <add>, %3, %cst_4 [1] : vector<8x128xf32> to vector<8xf32>
    %5 = vector.shape_cast %4 : vector<8xf32> to vector<8x1xf32>
    %cst_5 = arith.constant 1.562500e-02 : f32
    %6 = vector.broadcast %cst_5 : f32 to vector<8x1xf32>
    %7 = arith.mulf %5, %6 : vector<8x1xf32>
    %8 = arith.mulf %3, %3 : vector<8x128xf32>
    %cst_6 = arith.constant dense<0.000000e+00> : vector<8xf32>
    %9 = vector.multi_reduction <add>, %8, %cst_6 [1] : vector<8x128xf32> to vector<8xf32>
    %10 = vector.shape_cast %9 : vector<8xf32> to vector<8x1xf32>
    %cst_7 = arith.constant 1.562500e-02 : f32
    %11 = vector.broadcast %cst_7 : f32 to vector<8x1xf32>
    %12 = arith.mulf %10, %11 : vector<8x1xf32>
    %13 = arith.mulf %7, %7 : vector<8x1xf32>
    %14 = arith.subf %12, %13 : vector<8x1xf32>
    %cst_8 = arith.constant 0.000000e+00 : f32
    %15 = vector.broadcast %cst_8 : f32 to vector<8x1xf32>
    %16 = arith.maximumf %14, %15 : vector<8x1xf32>
    %17 = vector.broadcast %7 : vector<8x1xf32> to vector<8x128xf32>
    %18 = arith.subf %3, %17 : vector<8x128xf32>
    %cst_9 = arith.constant 9.99999974E-6 : f32
    %19 = vector.broadcast %cst_9 : f32 to vector<8x1xf32>
    %20 = arith.addf %16, %19 : vector<8x1xf32>
    %21 = math.rsqrt %20 : vector<8x1xf32>
    %22 = vector.broadcast %21 : vector<8x1xf32> to vector<8x128xf32>
    %23 = arith.mulf %18, %22 : vector<8x128xf32>
    %cst_10 = arith.constant 0.000000e+00 : f32
    %24 = vector.broadcast %cst_10 : f32 to vector<8x128xf32>
    %25 = arith.cmpf oge, %23, %24 : vector<8x128xf32>
    %cst_11 = arith.constant 2.000000e-01 : f32
    %26 = vector.broadcast %cst_11 : f32 to vector<8x128xf32>
    %27 = arith.mulf %26, %23 : vector<8x128xf32>
    %28 = arith.select %25, %23, %27 : vector<8x128xi1>, vector<8x128xf32>
    %29 = arith.truncf %28 : vector<8x128xf32> to vector<8x128xbf16>
    %c0_12 = arith.constant 0 : index
    %c0_13 = arith.constant 0 : index
    %c0_14 = arith.constant 0 : index
    %30 = vector.load %arg4[%c0_12, %c0_13, %c0_14] : memref<1x8x128xbf16, #tpu.memory_space<vmem>>, vector<1x8x128xbf16>
    %31 = vector.shape_cast %30 : vector<1x8x128xbf16> to vector<8x128xbf16>
    %32 = vector.shape_cast %29 : vector<8x128xbf16> to vector<1x8x128xbf16>
    tpu.vector_store %arg4[%c0_12, %c0_13, %c0_14], %32 {strides = array<i32>} : memref<1x8x128xbf16, #tpu.memory_space<vmem>>, vector<1x8x128xbf16>,
    return
  }
  func.func @transform_0(%arg0: i32, %arg1: i32) -> (i32, i32, i32) {
    %c0_i32 = arith.constant 0 : i32
    %c0_i32_0 = arith.constant 0 : i32
    %c0_i32_1 = arith.constant 0 : i32
    return %arg0, %c0_i32, %c0_i32_0 : i32, i32, i32
  }
  func.func @transform_1(%arg0: i32, %arg1: i32) -> (i32, i32) {
    %c0_i32 = arith.constant 0 : i32
    %c0_i32_0 = arith.constant 0 : i32
    return %arg1, %c0_i32 : i32, i32
  }
  func.func @transform_2(%arg0: i32, %arg1: i32) -> (i32, i32, i32) {
    %c0_i32 = arith.constant 0 : i32
    %c0_i32_0 = arith.constant 0 : i32
    return %arg0, %arg1, %c0_i32 : i32, i32, i32
  }
}

</mosaic_0001>

<bundles_post_ra>
// kernel: tpu_custom_call.1
= control target key start
LH: loop header
LB: loop body
LE: loop exit
PB: predicated region body
PF: predicated region fallthrough
CT: control target
= control target key end

     0   :  { %7 = vsyncpa [#allocation3], 0  ;;  %s909_s0 = inlined_call_operand.hbm [shape: bf16[2,64,128], index: 0, kind: input, shape index: {}]   ;;  %s910_s1 = inlined_call_operand.hbm [shape: bf16[8,64], index: 1, kind: input, shape index: {}]   ;;  %s911_s2 = inlined_call_operand.hbm [shape: bf16[2,8,128], index: 2, kind: output, shape index: {}]  }
   0x1   :  { %9 = vsyncpa [#allocation3 + $0x1], 0 }
   0x2   :  { %10 = vsyncpa [#allocation6], 0 }
   0x3   :  { %11 = vsyncpa [#allocation4], 0 }
   0x4   :  { %13 = vsyncpa [#allocation4 + $0x1], 0  ;;  %s689_s9 = smov 0   ;;  %s691_s10 = smov 0  }
   0x5   :  { %s693_s11 = smov 0   ;;  %s695_s12 = smov 0  }
   0x6   :  { %s697_s13 = smov 0   ;;  %s699_s14 = smov 0  }
   0x7 LB: > { %s399_s15 = sadd.s32 4294967295, %s665_s14   ;;  %s400_s16 = sadd.s32 4294967294, %s665_s14   ;;  %s665_s14 = sphi %s699_s14, %s19_s14   ;;  %s661_s13 = sphi %s697_s13, %s939_s13   ;;  %s657_s12 = sphi %s695_s12, %s938_s12   ;;  %s653_s11 = sphi %s693_s11, %s937_s11   ;;  %s649_s10 = sphi %s691_s10, %s936_s10   ;;  %s645_s9 = sphi %s689_s9, %s935_s9  }
   0x8   : > { %s38_s17 = sadd.s32 1, %s653_s11  ;;  %p45_p0 = scmp.ne.s32.totalorder %s653_s11, %s649_s10 }
   0x9   : > { %p46_p1 = scmp.eq.s32.totalorder %s665_s14, 0  ;;  %p51_p2 = scmp.ne.s32.totalorder %s649_s10, %s645_s9 }
   0xa   : > { %p727_p3 = scmp.eq.s32.totalorder %s399_s15, 0  ;;  %p103_p4 = scmp.eq.s32.totalorder %s399_s15, 1 }
   0xb   : > { %p731_p5 = por %p46_p1, %p45_p0  ;;  %p109_p6 = scmp.eq.s32.totalorder %s400_s16, 1 }
   0xc   : > { %s918_s18 = scalar_select %p727_p3, 1, 0 }
   0xd   : > { %p737_p7 = por %p727_p3, %p51_p2  ;;  %p741_p8 = por %p103_p4, %p45_p0 }
   0xe   : > { %p745_p9 = por %p109_p6, %p51_p2  ;;  %p401_p10 = scmp.ge.s32.totalorder %s665_s14, 1 }
   0xf   : > { %s920_s20 = scalar_select %p737_p7, 1, 0 }
  0x10   : > { %s921_s21 = scalar_select %p741_p8, 1, 0 }
  0x11   : > { %s922_s22 = scalar_select %p745_p9, 1, 0 }
  0x12   : > { %p116_p11 = scmp.lt.s32.totalorder %s665_s14, 3  ;;  %s667_s24 = smov [#allocation5]  }
  0x13   : > { %s131_s25 = sshll.u32 %s667_s24, 4  ;;  %p459_p1 = scmp.lt.s32.totalorder %s665_s14, 2  ;;  %s132_s25 = int_to_ptr.vmem [resolvable:$true] %s131_s25 }
  0x14   : > { %p752_p13 = pnand %p401_p10, %p116_p11  ;;  %s31_s28 = sadd.s32 1, %s661_s13 }
  0x15   : > { %p761_p4 = pnand %p459_p1, %p731_p5  ;;  %p772_p6 = scmp.ge.s32.totalorder %s31_s28, 2 }
  0x16   : > { %s923_s23 = scalar_select %p752_p13, 1, 0 }
  0x17   : > { %p446_p0 = pneg %p752_p13  ;;  %s142_s30 = sand.u32 1, %s653_s11  }
  0x18   : > { %s924_s26 = scalar_select %p761_p4, 1, 0 }
  0x19   : > { %p767_p2 = pnand %p446_p0, %p727_p3  ;;  %s521_s5 = scalar_lea.hbm %s910_s1, 64 }
  0x1a   : > { %s926_s29 = scalar_select %p772_p6, 1, 0 }
  0x1b   : > { %p522_p5 = scmp.ne.s32.totalorder %s910_s1, %s521_s5  ;;  %p523_p10 = pneg %p767_p2 }
  0x1c   : > { %p528_p0 = scmp.lt.u32.totalorder %s521_s5, %s910_s1 }
  0x1d   : > { %p524_p11 = pnand %p523_p10, %p522_p5 }
  0x1f   : > { %p525_p1 = pneg %p524_p11 }
  0x21   : > { %p530_p12 = pnand %p528_p0, %p525_p1 }
  0x23   : > { %533 = shalt.err (!%p530_p12)
}
  0x24   : > { %s534_s16 = scalar_lea.vmem %s132_s25, 64  ;;  %p542_p7 = scmp.lt.s32.totalorder %s132_s25, %s132_s25 }
  0x25   : > { %p535_p9 = scmp.ne.s32.totalorder %s132_s25, %s534_s16  ;;  %p543_p13 = scmp.lt.s32.totalorder %s534_s16, %s534_s16 }
  0x27   : > { %p537_p8 = pnand %p535_p9, %p523_p10  ;;  %p544_p4 = por %p543_p13, %p542_p7 }
  0x29   : > { %p538_p3 = pneg %p537_p8 }
  0x2b   : > { %p545_p6 = pnand %p544_p4, %p538_p3 }
  0x2d   : > { %548 = shalt.err (!%p545_p6)
}
  0x2e   : > { %449 = dma.hbm_to_vmem [thread:$0]  (!%p767_p2), %s910_s1, 64, %s132_s25, [#allocation6]  }
  0x2f   : > { %p927_p9 = scmp.ne.s32.totalorder %s926_s29, 0  ;;  %s404_s3 = sshll.u32 %s142_s30, 5 }
  0x30   : > { %s420_s5 = sshll.u32 %s661_s13, 9  ;;  %s146_s8 = scalar_lea.vmem [#allocation2], %s404_s3 }
  0x31   : > { %s941_s28 = smov (%p927_p9, %s31_s28), 0  ;;  %s803_s7 = scalar_lea.hbm %s909_s0, %s420_s5 }
  0x32   : > { %s35_s4 = ssub.s32 %s661_s13, %s941_s28  ;;  %s153_s15 = sshll.u32 %s146_s8, 4  ;;  %s810_s15 = int_to_ptr.vmem [resolvable:$true] %s153_s15 }
  0x33   : > { %p36_p3 = scmp.eq.s32.totalorder %s35_s4, 0  ;;  %s812_s29 = scalar_lea.sflag [#allocation3], %s142_s30 }
  0x34   : > { %s549_s16 = scalar_lea.hbm %s803_s7, 512  ;;  %p928_p8 = scmp.ne.s32.totalorder %s924_s26, 0 }
  0x35   : > { %s808_s25 = scalar_select %p36_p3, %s653_s11, %s38_s17  }
  0x36   : > { %p550_p7 = scmp.ne.s32.totalorder %s803_s7, %s549_s16  ;;  %p551_p12 = pneg %p928_p8 }
  0x37   : > { %s554_s3 = scalar_lea.hbm %s909_s0, 1024  ;;  %p555_p2 = scmp.lt.u32.totalorder %s803_s7, %s909_s0 }
  0x38   : > { %p552_p13 = pnand %p551_p12, %p550_p7  ;;  %p556_p6 = scmp.lt.u32.totalorder %s554_s3, %s549_s16 }
  0x39   : > { %p558_p10 = scmp.lt.u32.totalorder %s549_s16, %s803_s7 }
  0x3a   : > { %p553_p4 = pneg %p552_p13  ;;  %p557_p5 = por %p556_p6, %p555_p2 }
  0x3c   : > { %p559_p11 = por %p558_p10, %p557_p5 }
  0x3e   : > { %p560_p1 = pnand %p559_p11, %p553_p4 }
  0x40   : > { %563 = shalt.err (!%p560_p1)
}
  0x41   : > { %s564_s17 = scalar_lea.vmem %s810_s15, 512  ;;  %s668_s30 = smov [#allocation2]  }
  0x42   : > { %p565_p0 = scmp.ne.s32.totalorder %s810_s15, %s564_s17  ;;  %s569_s27 = sshll.u32 %s668_s30, 4  ;;  %s570_s27 = int_to_ptr.vmem [resolvable:$false] %s569_s27 }
  0x43   : > { %s571_s6 = scalar_lea.vmem %s570_s27, 1024  ;;  %p572_p7 = scmp.lt.s32.totalorder %s810_s15, %s570_s27 }
  0x44   : > { %p567_p9 = pnand %p565_p0, %p551_p12  ;;  %p573_p13 = scmp.lt.s32.totalorder %s571_s6, %s564_s17 }
  0x46   : > { %p568_p3 = pneg %p567_p9  ;;  %p574_p2 = por %p573_p13, %p572_p7 }
  0x48   : > { %p575_p6 = pnand %p574_p2, %p568_p3 }
  0x4a   : > { %578 = shalt.err (!%p575_p6)
}
  0x4b   : > { %s669_s8 = smov 64   ;;  %s670_s16 = smov 4  }
  0x4c   : > { %453 = dma.hbm_to_vmem [thread:$0]  (!%p928_p8), %s803_s7, 512, %s810_s15, %s812_s29, %s669_s8, %s669_s8, %s670_s16  }
  0x4d   : > { %p929_p12 = scmp.ne.s32.totalorder %s923_s23, 0 }
  0x4e   : > { %s843_s19 = sand.u32 (!%p929_p12), 1, %s649_s10   ;;  %p930_p4 = scmp.ne.s32.totalorder (!%p929_p12), %s920_s20, 0 }
  0x4f   : > { %165 = sbr.rel (%p929_p12) target bundleno = 505 (0x1f9), region = 28  ;;  %s408_s24 = sshll.u32 (!%p929_p12), %s843_s19, 5 }
  0x50   : > { %s168_s3 = scalar_lea.sflag (!%p929_p12), [#allocation3], %s843_s19  ;;  %s171_s4 = scalar_lea.vmem (!%p929_p12), [#allocation2], %s408_s24 }
  0x56   : > { %632 = dma.done.wait (%p930_p4), %s168_s3, 512  }
  0x57   : > { %634 = vsyncadd (%p930_p4), %s168_s3, 4294966784  ;;  %p931_p5 = scmp.ne.s32.totalorder %s918_s18, 0 }
  0x59   : > { %636 = dma.done.wait (%p931_p5), [#allocation6], 64  }
  0x5a   : > { %638 = vsyncadd (%p931_p5), [#allocation6], 4294967232  ;;  %v671_v0 = vmov 0.0   ;;  %vm672_vm0 = vmmov 0   ;;  %v515_v1 = vld [vmem:[%s171_s4] sm:$0xff]   ;;  %v516_v2 = vld [vmem:[%s171_s4 + $0x8] sm:$0xff]  }
  0x5b   : > { %426 = vmatprep.subr.bf16.mxu0 %v671_v0  ;;  %434 = vmatprep.mubr.msk.bf16.mxu0 %vm672_vm0, %v671_v0  ;;  %v517_v3 = vld [vmem:[%s171_s4 + $0x10] sm:$0xff]   ;;  %v518_v4 = vld [vmem:[%s171_s4 + $0x18] sm:$0xff]   ;;  %v197_v5 = vld [vmem:[#allocation5] sm:$0xf]  ;;  %vm230_vm1 = vcmask 523264   ;;  %s410_s18 = sshll.u32 %s843_s19, 2 }
  0x5c   : > { %427 = vmatpush3.bf16.msra.mxu0 %v515_v1  ;;  %s417_s20 = sshll.u32 %s657_s12, 6  ;;  %s195_s23 = scalar_lea.vmem [#allocation7], %s410_s18 }
  0x5d   : > { %428 = vmatprep.subr.bf16.mxu0 %v671_v0  ;;  %s308_s26 = sshll.u32 %s195_s23, 4  ;;  %s860_s29 = scalar_lea.hbm %s911_s2, %s417_s20  ;;  %s862_s26 = int_to_ptr.vmem [resolvable:$true] %s308_s26 }
  0x5e   : > { %s294_s5 = scalar_lea.sflag [#allocation4], %s843_s19  ;;  %s579_s17 = scalar_lea.vmem %s862_s26, 64 }
  0x5f   : > { %p580_p8 = scmp.ne.s32.totalorder %s862_s26, %s579_s17  ;;  %p932_p10 = scmp.ne.s32.totalorder %s921_s21, 0 }
  0x60   : > { %429 = vmatpush3.bf16.msra.mxu0 %v516_v2  ;;  %s673_s12 = smov [#allocation7]  }
  0x61   : > { %430 = vmatprep.subr.bf16.mxu0 %v671_v0  ;;  %p581_p11 = pnand %p580_p8, %p932_p10  ;;  %s583_s30 = sshll.u32 %s673_s12, 4  ;;  %s584_s30 = int_to_ptr.vmem [resolvable:$false] %s583_s30 }
  0x62   : > { %s585_s27 = scalar_lea.vmem %s584_s30, 128  ;;  %p586_p0 = scmp.lt.s32.totalorder %s862_s26, %s584_s30 }
  0x63   : > { %p582_p1 = pneg %p581_p11  ;;  %p587_p9 = scmp.lt.s32.totalorder %s585_s27, %s579_s17 }
  0x64   : > { %431 = vmatpush3.bf16.msra.mxu0 %v517_v3 }
  0x65   : > { %432 = vmatprep.subr.bf16.mxu0 %v671_v0  ;;  %p588_p3 = por %p587_p9, %p586_p0 }
  0x67   : > { %p589_p7 = pnand %p588_p3, %p582_p1 }
  0x68   : > { %433 = vmatpush3.bf16.msra.mxu0 %v518_v4 }
  0x6b   : > { %435 = vmatmul.mubr.msk.bf16.vlgmr.msra.gmra.mrb[0].mxu0 %vm230_vm1, %v197_v5 }
 0x13e   : > { %v268_v6 = vpop.f32.mrb[0].mxu0 }
 0x13f   : > { %274 = vadd.xlane.f32.xlu0 %v268_v6  ;;  %v436_v7 = vpop.f32.mrb[1].mxu0  ;;  %v277_v10 = vmul.f32 %v268_v6, %v268_v6 }
 0x140   : > { %v271_v8 = vpop.f32.mrb[2].mxu0 }
 0x141   : > { %v437_v9 = vpop.f32.mrb[3].mxu0 }
 0x143   : > { %278 = vadd.xlane.f32.xlu0 %v277_v10 }
 0x1cc   : > { %v275_v11 = vpop.xlane.xlu0 %274 }
 0x1cd   : > { %v276_v12 = vmul.f32 0.015625, %v275_v11 }
 0x1cf   : > { %v281_v14 = vmul.f32 %v276_v12, %v276_v12  ;;  %v284_v19 = vsub.f32 %v268_v6, %v276_v12 }
 0x1d0   : > { %v279_v13 = vpop.xlane.xlu0 %278 }
 0x1d1   : > { %v280_v15 = vmul.f32 0.015625, %v279_v13 }
 0x1d3   : > { %v282_v16 = vsub.f32 %v280_v15, %v281_v14 }
 0x1d5   : > { %v283_v17 = vmax.f32 %v282_v16, 0.0 }
 0x1d7   : > { %v285_v18 = vadd.f32 1e-05, %v283_v17 }
 0x1d9   : > { %519 = vrsqrt.f32 %v285_v18 }
 0x1e3   : > { %v520_v20 = vpop.eup %519 }
 0x1e4   : > { %v287_v21 = vmul.f32 %v520_v20, %v284_v19 }
 0x1e6   : > { %vm288_vm2 = vcmp.ge.f32.partialorder %v287_v21, 0.0  ;;  %v289_v22 = vmul.f32 0.2, %v287_v21 }
 0x1e8   : > { %v290_v23 = vsel %vm288_vm2, %v287_v21, %v289_v22 }
 0x1e9   : > { %v291_v24 = vpack.c.bf16 %v290_v23, %v290_v23 }
 0x1eb   : > { %292 = vst [vmem:[%s195_s23] sm:$0xf] %v291_v24 }
 0x1ec   : > { %592 = shalt.err (!%p589_p7)
}
 0x1ed   : > { %s593_s6 = scalar_lea.hbm %s860_s29, 64  ;;  %s597_s19 = scalar_lea.hbm %s911_s2, 128 }
 0x1ee   : > { %p594_p13 = scmp.ne.s32.totalorder %s860_s29, %s593_s6  ;;  %p598_p12 = scmp.lt.u32.totalorder %s860_s29, %s911_s2 }
 0x1ef   : > { %p599_p4 = scmp.lt.u32.totalorder %s597_s19, %s593_s6  ;;  %p601_p8 = scmp.lt.u32.totalorder %s593_s6, %s860_s29 }
 0x1f0   : > { %p595_p2 = pnand %p594_p13, %p932_p10 }
 0x1f1   : > { %p600_p5 = por %p599_p4, %p598_p12 }
 0x1f2   : > { %p596_p6 = pneg %p595_p2 }
 0x1f3   : > { %p602_p11 = por %p601_p8, %p600_p5 }
 0x1f5   : > { %p603_p1 = pnand %p602_p11, %p596_p6 }
 0x1f7   : > { %606 = shalt.err (!%p603_p1)
}
 0x1f8   : > { %444 = dma.vmem_to_hbm [thread:$0]  (%p932_p10), %s862_s26, 64, %s860_s29, %s294_s5  }
 0x1f9 PF: > { %s320_s4 = sand.u32 1, %s645_s9   ;;  %p933_p0 = scmp.ne.s32.totalorder %s922_s22, 0 }
 0x1fa   : > { %p934_p9 = scmp.ge.s32.totalorder %s665_s14, 2  ;;  %s321_s18 = scalar_lea.sflag [#allocation4], %s320_s4 }
 0x1fc   : > { %p455_p3 = pnand %p934_p9, %p933_p0 }
 0x1fe   : > { %640 = dma.done.wait (!%p455_p3), %s321_s18, 64  }
 0x1ff   : > { %642 = vsyncadd (!%p455_p3), %s321_s18, 4294967232  ;;  %s19_s14 = sadd.s32 1, %s665_s14   ;;  %s935_s9 = smov %s649_s10 }
 0x200   : > { %p16_p7 = scmp.ge.s32.totalorder %s19_s14, 4   ;;  %s936_s10 = smov %s653_s11 }
 0x201   : > { %s937_s11 = smov %s808_s25  ;;  %s938_s12 = smov %s661_s13 }
 0x202   : > { %s939_s13 = smov %s941_s28  ;;  %18 = sbr.rel (!%p16_p7) target bundleno = 7 (0x7), region = 78 }
 0x209   :  { %326 = vsyncpa [#allocation3], 1 }
 0x20a   :  { %328 = vsyncpa [#allocation3 + $0x1], 1 }
 0x20b   :  { %329 = vsyncpa [#allocation6], 1 }
 0x20c   :  { %330 = vsyncpa [#allocation4], 1 }
 0x20d   :  { %332 = vsyncpa [#allocation4 + $0x1], 1 }

</bundles_post_ra>
